<compile_context>
chip_gen: v7x
topology: tpu7x:2x2x1
jax: 0.10.0
libtpu: 0.0.40
codegen_flags: <defaults>
</compile_context>

<pallas_src>
import functools
import math

import jax
import jax.numpy as jnp
from jax import lax
from jax.experimental import pallas as pl
from jax.experimental.pallas import tpu as pltpu


def _pair(v):
    if isinstance(v, int):
        return v, v
    v = tuple(int(e) for e in v)
    return (v[0], v[0]) if len(v) == 1 else (v[0], v[1])


def _same_pad_amounts(h, w, kh, kw, sh, sw):
    # Identical arithmetic to the PyTorch forward().
    extra_h = (math.ceil(w / sw) - 1) * sw - w + kw
    extra_v = (math.ceil(h / sh) - 1) * sh - h + kh
    left = extra_h // 2
    right = extra_h - left
    top = extra_v // 2
    bottom = extra_v - top
    return top, bottom, left, right


def _maxpool_kernel(x_ref, o_ref, hmax_ref, *, kh, kw, sh, sw, ho_tile, wo, multi_h):
    """Pool one (channel-block, output-row-block) tile.

    x_ref    : (Hp, Wp, nc_tile)      zero-padded input, full padded height
    o_ref    : (ho_tile, Wo, nc_tile) output rows for this grid step
    hmax_ref : (ho_tile, Wp, nc_tile) VMEM scratch holding the H-reduced rows
    """
    if multi_h:
        row0 = pl.multiple_of(pl.program_id(1) * (ho_tile * sh), ho_tile * sh)
    else:
        row0 = 0  # single output-row tile: static start

    # Pass 1 -- max over the kh row taps. Each tap is a single load, strided
    # only along the cheap major (H) axis and contiguous over (W, C).
    # Accumulate in the native dtype starting from the first tap
    # (no -inf fill, no float32 upcast).
    hmax = x_ref[pl.ds(row0, ho_tile, stride=sh), :, :]
    for i in range(1, kh):
        hmax = jnp.maximum(hmax, x_ref[pl.ds(row0 + i, ho_tile, stride=sh), :, :])
    hmax_ref[...] = hmax

    # Pass 2 -- max over the kw column taps with sublane-strided loads from the
    # small scratch: kw strided sublane accesses total instead of kh*kw.
    out = hmax_ref[:, pl.ds(0, wo, stride=sw), :]
    for j in range(1, kw):
        out = jnp.maximum(out, hmax_ref[:, pl.ds(j, wo, stride=sw), :])
    o_ref[...] = out


def _maxpool_core(xp, kh, kw, sh, sw, *, nc_tile=None, ho_tile=None):
    """Max-pool a zero-padded (Hp, Wp, NC) array -> (Ho, Wo, NC)."""
    hp, wp, nc = xp.shape
    ho = (hp - kh) // sh + 1  # ceil_mode=False
    wo = (wp - kw) // sw + 1
    assert ho >= 1 and wo >= 1, "pooled output would be empty"
    itemsize = jnp.dtype(xp.dtype).itemsize

    # Channel tiling: keep the lane axis a dense multiple of 128 when possible.
    if nc_tile is None:
        nc_tile = 128 if nc % 128 == 0 else nc
    assert nc % nc_tile == 0
    nc_blocks = nc // nc_tile

    # Output-row tiling: largest divisor of Ho that (a) keeps the output block
    # around <=1 MiB and (b) yields >=2 H steps when Ho is large enough, so the
    # software pipeline has work to overlap (tiny inputs degenerate to 1 step).
    if ho_tile is None:
        budget_rows = max(8, (1 << 20) // max(1, wo * nc_tile * itemsize))
        target = min(ho, budget_rows, max(8, ho // 2))
        ho_tile = 1
        for t in range(1, ho + 1):
            if t <= target and ho % t == 0:
                ho_tile = t
    assert ho % ho_tile == 0
    h_blocks = ho // ho_tile

    kernel = functools.partial(
        _maxpool_kernel, kh=kh, kw=kw, sh=sh, sw=sw,
        ho_tile=ho_tile, wo=wo, multi_h=(h_blocks > 1))

    # The input block spans the full padded (Hp, Wp) plane of one channel
    # block; its block index only changes with the (outer) channel-block grid
    # axis, so it is DMA'd once per channel block and reused across the inner
    # output-row steps while the next channel block is prefetched.  For
    # FPN-sized feature maps this block is a few MiB at most (fits the 16/32
    # MiB scoped-VMEM defaults of v5e/v6e/v7x with double buffering); very
    # large spatial inputs would additionally need halo-tiled H fetches.
    return pl.pallas_call(
        kernel,
        out_shape=jax.ShapeDtypeStruct((ho, wo, nc), xp.dtype),
        grid=(nc_blocks, h_blocks),
        in_specs=[pl.BlockSpec((hp, wp, nc_tile), lambda c, h: (0, 0, c))],
        out_specs=pl.BlockSpec((ho_tile, wo, nc_tile), lambda c, h: (h, 0, c)),
        scratch_shapes=[pltpu.VMEM((ho_tile, wp, nc_tile), xp.dtype)],
        compiler_params=pltpu.CompilerParams(
            dimension_semantics=("parallel", "parallel"),  # no reduction axis
            vmem_limit_bytes=32 * 1024 * 1024,
            allow_input_fusion=[True],  # let XLA fuse the transpose+pad producer
        ),
        cost_estimate=pl.CostEstimate(
            flops=kh * kw * ho * wo * nc,
            transcendentals=0,
            bytes_accessed=(hp * wp * nc + ho * wo * nc) * itemsize,
        ),
    )(xp)


def maxpool2d_static_same_padding(x_nchw, kernel_size, stride, *,
                                  nc_tile=None, ho_tile=None):
    """Equivalent of MaxPool2dStaticSamePadding(kernel_size, stride)(x_nchw)."""
    kh, kw = _pair(kernel_size)
    sh, sw = _pair(stride)
    n, c, h, w = x_nchw.shape
    top, bottom, left, right = _same_pad_amounts(h, w, kh, kw, sh, sw)

    # NCHW -> (H, W, N*C): fold the batch into the channel axis so the 128-lane
    # axis is dense whenever N*C % 128 == 0; pooling then happens only along
    # the major (H) and sublane (W) axes.
    x = jnp.transpose(x_nchw, (2, 3, 0, 1)).reshape(h, w, n * c)
    # Zero padding = F.pad default (zeros participate in the max).  lax.pad
    # also crops for negative amounts, matching F.pad when kernel < stride.
    # XLA fuses this with the transpose above into a single copy pass.
    x = lax.pad(x, jnp.asarray(0, x.dtype),
                ((top, bottom, 0), (left, right, 0), (0, 0, 0)))

    out = _maxpool_core(x, kh, kw, sh, sw, nc_tile=nc_tile, ho_tile=ho_tile)
    ho, wo, _ = out.shape
    # (Ho, Wo, N*C) -> NCHW (PyTorch output convention).
    return jnp.transpose(out.reshape(ho, wo, n, c), (2, 3, 0, 1))


def _reference(x_nchw, kernel_size, stride):
    """Pure-JAX reference with identical semantics (for the correctness check)."""
    kh, kw = _pair(kernel_size)
    sh, sw = _pair(stride)
    n, c, h, w = x_nchw.shape
    top, bottom, left, right = _same_pad_amounts(h, w, kh, kw, sh, sw)
    x = jnp.pad(x_nchw, ((0, 0), (0, 0), (top, bottom), (left, right)),
                constant_values=0)
    if jnp.issubdtype(x.dtype, jnp.floating):
        init = jnp.asarray(-jnp.inf, x.dtype)
    else:
        init = jnp.asarray(jnp.iinfo(x.dtype).min, x.dtype)
    return lax.reduce_window(
        x, init, lax.max,
        window_dimensions=(1, 1, kh, kw),
        window_strides=(1, 1, sh, sw),
        padding="VALID",
    )


if __name__ == "__main__":
    # MaxPool2dStaticSamePadding(3, 2) -- the EfficientDet FPN configuration.
    # No learnable parameters.
    KERNEL_SIZE, STRIDE = 3, 2

    key = jax.random.PRNGKey(0)
    k1, k2 = jax.random.split(key)

    x_small = jax.random.normal(k1, (2, 4, 16, 16), dtype=jnp.float32)      # NCHW
    x_wide = jax.random.normal(k2, (2, 128, 16, 16), dtype=jnp.float32)     # N*C=256 lanes

    cases = [
        # (input, extra kwargs, expected output shape)
        (x_small, {}, (2, 4, 8, 8)),            # module's small test shape
        (x_small, {"ho_tile": 4}, (2, 4, 8, 8)),  # force multi-step output-row grid
        (x_wide, {}, (2, 128, 8, 8)),            # lane-dense folded channels, 2 channel blocks
    ]

    for x, extra, expected_shape in cases:
        fn = jax.jit(functools.partial(
            maxpool2d_static_same_padding,
            kernel_size=KERNEL_SIZE, stride=STRIDE, **extra))
        out = jax.block_until_ready(fn(x))
        ref = jax.block_until_ready(_reference(x, KERNEL_SIZE, STRIDE))
        assert out.shape == expected_shape, (out.shape, expected_shape)
        assert out.shape == ref.shape, (out.shape, ref.shape)
        assert out.dtype == x.dtype, (out.dtype, x.dtype)
        assert bool(jnp.array_equal(out, ref)), "mismatch vs reference"

    print("KERNEL_OK")
</pallas_src>

<mosaic_0001>
module attributes {stable_mosaic.version = 11 : i64} {
  func.func @_maxpool_kernel(%arg0: i32, %arg1: i32, %arg2: memref<17x17x8xf32, #tpu.memory_space<vmem>>, %arg3: memref<8x8x8xf32, #tpu.memory_space<vmem>>, %arg4: memref<8x17x8xf32, #tpu.memory_space<vmem>>) attributes {dimension_semantics = [#tpu.dimension_semantics<parallel>, #tpu.dimension_semantics<parallel>], iteration_bounds = array<i64: 1, 1>, scalar_prefetch = 0 : i64, scratch_operands = 1 : i64, tpu.core_type = #tpu.core_type<tc>, window_params = [{transform_indices = @transform_0, window_bounds = array<i64: 17, 17, 8>}, {transform_indices = @transform_1, window_bounds = array<i64: 8, 8, 8>}]} {
    %c0 = arith.constant 0 : index
    %c0_0 = arith.constant 0 : index
    %c0_1 = arith.constant 0 : index
    %0 = tpu.strided_load %arg2[%c0, %c0_0, %c0_1] {strides = array<i32: 2, 1, 1>} : memref<17x17x8xf32, #tpu.memory_space<vmem>>, vector<8x17x8xf32>
    %c1 = arith.constant 1 : index
    %c0_2 = arith.constant 0 : index
    %c0_3 = arith.constant 0 : index
    %1 = tpu.strided_load %arg2[%c1, %c0_2, %c0_3] {strides = array<i32: 2, 1, 1>} : memref<17x17x8xf32, #tpu.memory_space<vmem>>, vector<8x17x8xf32>
    %2 = arith.maximumf %0, %1 : vector<8x17x8xf32>
    %c2 = arith.constant 2 : index
    %c0_4 = arith.constant 0 : index
    %c0_5 = arith.constant 0 : index
    %3 = tpu.strided_load %arg2[%c2, %c0_4, %c0_5] {strides = array<i32: 2, 1, 1>} : memref<17x17x8xf32, #tpu.memory_space<vmem>>, vector<8x17x8xf32>
    %4 = arith.maximumf %2, %3 : vector<8x17x8xf32>
    %c0_6 = arith.constant 0 : index
    %c0_7 = arith.constant 0 : index
    %c0_8 = arith.constant 0 : index
    %5 = vector.load %arg4[%c0_6, %c0_7, %c0_8] : memref<8x17x8xf32, #tpu.memory_space<vmem>>, vector<8x17x8xf32>
    tpu.vector_store %arg4[%c0_6, %c0_7, %c0_8], %4 {strides = array<i32>} : memref<8x17x8xf32, #tpu.memory_space<vmem>>, vector<8x17x8xf32>,
    %c0_9 = arith.constant 0 : index
    %c0_10 = arith.constant 0 : index
    %c0_11 = arith.constant 0 : index
    %6 = tpu.strided_load %arg4[%c0_9, %c0_10, %c0_11] {strides = array<i32: 1, 2, 1>} : memref<8x17x8xf32, #tpu.memory_space<vmem>>, vector<8x8x8xf32>
    %c0_12 = arith.constant 0 : index
    %c1_13 = arith.constant 1 : index
    %c0_14 = arith.constant 0 : index
    %7 = tpu.strided_load %arg4[%c0_12, %c1_13, %c0_14] {strides = array<i32: 1, 2, 1>} : memref<8x17x8xf32, #tpu.memory_space<vmem>>, vector<8x8x8xf32>
    %8 = arith.maximumf %6, %7 : vector<8x8x8xf32>
    %c0_15 = arith.constant 0 : index
    %c2_16 = arith.constant 2 : index
    %c0_17 = arith.constant 0 : index
    %9 = tpu.strided_load %arg4[%c0_15, %c2_16, %c0_17] {strides = array<i32: 1, 2, 1>} : memref<8x17x8xf32, #tpu.memory_space<vmem>>, vector<8x8x8xf32>
    %10 = arith.maximumf %8, %9 : vector<8x8x8xf32>
    %c0_18 = arith.constant 0 : index
    %c0_19 = arith.constant 0 : index
    %c0_20 = arith.constant 0 : index
    %11 = vector.load %arg3[%c0_18, %c0_19, %c0_20] : memref<8x8x8xf32, #tpu.memory_space<vmem>>, vector<8x8x8xf32>
    tpu.vector_store %arg3[%c0_18, %c0_19, %c0_20], %10 {strides = array<i32>} : memref<8x8x8xf32, #tpu.memory_space<vmem>>, vector<8x8x8xf32>,
    return
  }
  func.func @transform_0(%arg0: i32, %arg1: i32) -> (i32, i32, i32) {
    %c0_i32 = arith.constant 0 : i32
    %c0_i32_0 = arith.constant 0 : i32
    %c0_i32_1 = arith.constant 0 : i32
    return %c0_i32, %c0_i32_0, %arg0 : i32, i32, i32
  }
  func.func @transform_1(%arg0: i32, %arg1: i32) -> (i32, i32, i32) {
    %c0_i32 = arith.constant 0 : i32
    %c0_i32_0 = arith.constant 0 : i32
    return %arg1, %c0_i32, %arg0 : i32, i32, i32
  }
}

</mosaic_0001>

<bundles_post_ra>
// kernel: maxpool2d_static_same_padding.2
= control target key start
LH: loop header
LB: loop body
LE: loop exit
PB: predicated region body
PF: predicated region fallthrough
CT: control target
= control target key end

     0   :  { %s1051_s0 = inlined_call_operand.vmem [shape: f32[16,16,8], index: 0, kind: input, shape index: {}]   ;;  %s1052_s1 = inlined_call_operand.<no memory space> [shape: f32[], index: 1, kind: input, shape index: {}]   ;;  %s1053_s2 = inlined_call_operand.vmem [shape: f32[8,8,8], index: 2, kind: output, shape index: {}]  }
   0x1   :  { %v657_v0 = vstv %s1052_s1 }
   0x2   :  { %v10_v1 = vld [vmem:[%s1051_s0] sm:$0xff]  ;;  %v11_v2 = vlaneseq  ;;  %v608_v3 = vld [vmem:[%s1051_s0 + $0x8] sm:$0xff]  ;;  %30 = vst [vmem:[#allocation8 + $0x10] sm:$0xff] %v657_v0  ;;  %v609_v4 = vld [vmem:[%s1051_s0 + $0x10] sm:$0xff]  ;;  %vm507_vm1 = vcmask 64512   ;;  %vm510_vm2 = vcmask 57344  }
   0x3   :  { %53 = vst [vmem:[#allocation8 + $0x28] sm:$0xff] %v657_v0  ;;  %76 = vst [vmem:[#allocation8 + $0x40] sm:$0xff] %v657_v0  ;;  %v610_v5 = vld [vmem:[%s1051_s0 + $0x18] sm:$0xff]  ;;  %v611_v6 = vld [vmem:[%s1051_s0 + $0x20] sm:$0xff] }
   0x4   :  { %99 = vst [vmem:[#allocation8 + $0x58] sm:$0xff] %v657_v0  ;;  %122 = vst [vmem:[#allocation8 + $0x70] sm:$0xff] %v657_v0  ;;  %v612_v7 = vld [vmem:[%s1051_s0 + $0x28] sm:$0xff]  ;;  %v694_v8 = vand.u32 127, %v11_v2  ;;  %v613_v9 = vld [vmem:[%s1051_s0 + $0x30] sm:$0xff] }
   0x5   :  { %145 = vst [vmem:[#allocation8 + $0x88] sm:$0xff] %v657_v0  ;;  %168 = vst [vmem:[#allocation8 + $0xa0] sm:$0xff] %v657_v0  ;;  %v614_v10 = vld [vmem:[%s1051_s0 + $0x38] sm:$0xff]  ;;  %v615_v11 = vld [vmem:[%s1051_s0 + $0x40] sm:$0xff] }
   0x6   :  { %191 = vst [vmem:[#allocation8 + $0xb8] sm:$0xff] %v657_v0  ;;  %214 = vst [vmem:[#allocation8 + $0xd0] sm:$0xff] %v657_v0  ;;  %v616_v12 = vld [vmem:[%s1051_s0 + $0x48] sm:$0xff]  ;;  %v617_v13 = vld [vmem:[%s1051_s0 + $0x50] sm:$0xff]  ;;  %vm14_vm0 = vcmp.lt.s32.totalorder %v694_v8, 8 }
   0x7   :  { %237 = vst [vmem:[#allocation8 + $0xe8] sm:$0xff] %v657_v0  ;;  %260 = vst [vmem:[#allocation8 + $0x100] sm:$0xff] %v657_v0  ;;  %v618_v14 = vld [vmem:[%s1051_s0 + $0x58] sm:$0xff]  ;;  %v619_v15 = vld [vmem:[%s1051_s0 + $0x60] sm:$0xff]  ;;  %v727_v18 = vsel %vm14_vm0, %v10_v1, %v657_v0  ;;  %v732_v19 = vsel %vm14_vm0, %v608_v3, %v657_v0  ;;  %v737_v20 = vsel %vm14_vm0, %v609_v4, %v657_v0 }
   0x8   :  { %283 = vst [vmem:[#allocation8 + $0x118] sm:$0xff] %v657_v0  ;;  %306 = vst [vmem:[#allocation8 + $0x130] sm:$0xff] %v657_v0  ;;  %v620_v16 = vld [vmem:[%s1051_s0 + $0x68] sm:$0xff]  ;;  %v621_v17 = vld [vmem:[%s1051_s0 + $0x70] sm:$0xff]  ;;  %v742_v21 = vsel %vm14_vm0, %v610_v5, %v657_v0  ;;  %v756_v25 = vsel %vm14_vm0, %v611_v6, %v657_v0  ;;  %v761_v26 = vsel %vm14_vm0, %v612_v7, %v657_v0 }
   0x9   :  { %329 = vst [vmem:[#allocation8 + $0x148] sm:$0xff] %v657_v0  ;;  %352 = vst [vmem:[#allocation8 + $0x160] sm:$0xff] %v657_v0  ;;  %v622_v22 = vld [vmem:[%s1051_s0 + $0x78] sm:$0xff]  ;;  %v623_v23 = vld [vmem:[%s1051_s0 + $0x80] sm:$0xff]  ;;  %v766_v27 = vsel %vm14_vm0, %v613_v9, %v657_v0  ;;  %v771_v28 = vsel %vm14_vm0, %v614_v10, %v657_v0  ;;  %v785_v32 = vsel %vm14_vm0, %v615_v11, %v657_v0 }
   0xa   :  { %375 = vst [vmem:[#allocation8 + $0x178] sm:$0xff] %v657_v0  ;;  %384 = vst [vmem:[#allocation8 + $0x190] sm:$0xff] %v657_v0  ;;  %v624_v24 = vld [vmem:[%s1051_s0 + $0x88] sm:$0xff]  ;;  %v625_v29 = vld [vmem:[%s1051_s0 + $0x90] sm:$0xff]  ;;  %v790_v33 = vsel %vm14_vm0, %v616_v12, %v657_v0  ;;  %v795_v34 = vsel %vm14_vm0, %v617_v13, %v657_v0  ;;  %v800_v35 = vsel %vm14_vm0, %v618_v14, %v657_v0 }
   0xb   :  { %v626_v30 = vld [vmem:[%s1051_s0 + $0x98] sm:$0xff]  ;;  %v627_v31 = vld [vmem:[%s1051_s0 + $0xa0] sm:$0xff]  ;;  %v628_v36 = vld [vmem:[%s1051_s0 + $0xa8] sm:$0xff]  ;;  %v814_v39 = vsel %vm14_vm0, %v619_v15, %v657_v0  ;;  %v819_v40 = vsel %vm14_vm0, %v620_v16, %v657_v0  ;;  %v824_v41 = vsel %vm14_vm0, %v621_v17, %v657_v0  ;;  %v829_v42 = vsel %vm14_vm0, %v622_v22, %v657_v0 }
   0xc   :  { %v629_v37 = vld [vmem:[%s1051_s0 + $0xb0] sm:$0xff]  ;;  %v630_v38 = vld [vmem:[%s1051_s0 + $0xb8] sm:$0xff]  ;;  %v631_v43 = vld [vmem:[%s1051_s0 + $0xc0] sm:$0xff]  ;;  %v843_v46 = vsel %vm14_vm0, %v623_v23, %v657_v0  ;;  %v848_v47 = vsel %vm14_vm0, %v624_v24, %v657_v0  ;;  %v853_v48 = vsel %vm14_vm0, %v625_v29, %v657_v0  ;;  %v858_v49 = vsel %vm14_vm0, %v626_v30, %v657_v0 }
   0xd   :  { %v632_v44 = vld [vmem:[%s1051_s0 + $0xc8] sm:$0xff]  ;;  %v633_v45 = vld [vmem:[%s1051_s0 + $0xd0] sm:$0xff]  ;;  %v634_v50 = vld [vmem:[%s1051_s0 + $0xd8] sm:$0xff]  ;;  %v872_v53 = vsel %vm14_vm0, %v627_v31, %v657_v0  ;;  %v877_v54 = vsel %vm14_vm0, %v628_v36, %v657_v0  ;;  %v882_v55 = vsel %vm14_vm0, %v629_v37, %v657_v0  ;;  %v887_v56 = vsel %vm14_vm0, %v630_v38, %v657_v0 }
   0xe   :  { %v635_v51 = vld [vmem:[%s1051_s0 + $0xe0] sm:$0xff]  ;;  %v636_v52 = vld [vmem:[%s1051_s0 + $0xe8] sm:$0xff]  ;;  %v637_v57 = vld [vmem:[%s1051_s0 + $0xf0] sm:$0xff]  ;;  %v898_v59 = vsel %vm14_vm0, %v631_v43, %v657_v0  ;;  %v903_v60 = vsel %vm14_vm0, %v632_v44, %v657_v0  ;;  %v908_v61 = vsel %vm14_vm0, %v633_v45, %v657_v0  ;;  %v913_v62 = vsel %vm14_vm0, %v634_v50, %v657_v0 }
   0xf   :  { %v638_v58 = vld [vmem:[%s1051_s0 + $0xf8] sm:$0xff]  ;;  %v387_v63 = vld [vmem:[#allocation8 + $0x10] sm:$0x1]  ;;  %v390_v1 = vld [vmem:[#allocation8 + $0x40] sm:$0x1]  ;;  %v918_v3 = vsel %vm14_vm0, %v635_v51, %v657_v0  ;;  %v923_v4 = vsel %vm14_vm0, %v636_v52, %v657_v0  ;;  %v928_v5 = vsel %vm14_vm0, %v637_v57, %v657_v0  ;;  %v434_v15 = vmax.f32 %v727_v18, %v737_v20 }
  0x10   :  { %v393_v2 = vld [vmem:[#allocation8 + $0x70] sm:$0x1]  ;;  %v933_v6 = vsel %vm14_vm0, %v638_v58, %v657_v0  ;;  %v396_v7 = vld [vmem:[#allocation8 + $0xa0] sm:$0x1]  ;;  %v412_v13 = vld [vmem:[#allocation8 + $0x28] sm:$0x1]  ;;  %v435_v16 = vmax.f32 %v732_v19, %v742_v21  ;;  %v437_v8 = vmax.f32 %v756_v25, %v766_v27  ;;  %v438_v17 = vmax.f32 %v761_v26, %v771_v28 }
  0x11   :  { %v935_v9 = vld [vmem:[#allocation8 + $0xd0] sm:$0x1]  ;;  %v937_v10 = vld [vmem:[#allocation8 + $0x100] sm:$0x1]  ;;  %v415_v14 = vld [vmem:[#allocation8 + $0x58] sm:$0x1]  ;;  %v436_v29 = vmax.f32 %v387_v63, %v412_v13  ;;  %v440_v31 = vmax.f32 %v785_v32, %v795_v34  ;;  %v441_v18 = vmax.f32 %v790_v33, %v800_v35  ;;  %v443_v27 = vmax.f32 %v814_v39, %v824_v41 }
  0x12   :  { %v939_v11 = vld [vmem:[#allocation8 + $0x130] sm:$0x1]  ;;  %v941_v12 = vld [vmem:[#allocation8 + $0x160] sm:$0x1]  ;;  %v418_v22 = vld [vmem:[#allocation8 + $0x88] sm:$0x1]  ;;  %v439_v30 = vmax.f32 %v390_v1, %v415_v14  ;;  %v444_v28 = vmax.f32 %v819_v40, %v829_v42  ;;  %v446_v38 = vmax.f32 %v843_v46, %v853_v48  ;;  %v447_v34 = vmax.f32 %v848_v47, %v858_v49 }
  0x13   :  { %v421_v23 = vld [vmem:[#allocation8 + $0xb8] sm:$0x1]  ;;  %v424_v24 = vld [vmem:[#allocation8 + $0xe8] sm:$0x1]  ;;  %v442_v21 = vmax.f32 %v393_v2, %v418_v22  ;;  %v449_v35 = vmax.f32 %v872_v53, %v882_v55  ;;  %v461_v44 = vld [vmem:[#allocation8 + $0x40] sm:$0x1]  ;;  %v450_v45 = vmax.f32 %v877_v54, %v887_v56  ;;  %v452_v42 = vmax.f32 %v898_v59, %v908_v61 }
  0x14   :  { %v427_v20 = vld [vmem:[#allocation8 + $0x118] sm:$0x1]  ;;  %v430_v36 = vld [vmem:[#allocation8 + $0x148] sm:$0x1]  ;;  %v445_v37 = vmax.f32 %v396_v7, %v421_v23  ;;  %v448_v43 = vmax.f32 %v935_v9, %v424_v24  ;;  %v453_v48 = vmax.f32 %v903_v60, %v913_v62  ;;  %v464_v50 = vld [vmem:[#allocation8 + $0x70] sm:$0x1]  ;;  %v455_v51 = vmax.f32 %v918_v3, %v928_v5 }
  0x15   :  { %v433_v19 = vld [vmem:[#allocation8 + $0x178] sm:$0x1]  ;;  %v451_v41 = vmax.f32 %v937_v10, %v427_v20  ;;  %v454_v49 = vmax.f32 %v939_v11, %v430_v36  ;;  %v456_v52 = vmax.f32 %v923_v4, %v933_v6  ;;  %v467_v56 = vld [vmem:[#allocation8 + $0xa0] sm:$0x1]  ;;  %v470_v57 = vld [vmem:[#allocation8 + $0xd0] sm:$0x1]  ;;  %v483_v63 = vmax.f32 %v434_v15, %v756_v25 }
  0x16   :  { %v457_v55 = vmax.f32 %v941_v12, %v433_v19  ;;  %v473_v58 = vld [vmem:[#allocation8 + $0x100] sm:$0x1]  ;;  %v484_v61 = vmax.f32 %v435_v16, %v761_v26  ;;  %v485_v1 = vmax.f32 %v436_v29, %v461_v44  ;;  %v486_v62 = vmax.f32 %v437_v8, %v785_v32  ;;  %v476_v2 = vld [vmem:[#allocation8 + $0x130] sm:$0x1] }
  0x17   :  { %v487_v7 = vmax.f32 %v438_v17, %v790_v33  ;;  %v488_v9 = vmax.f32 %v439_v30, %v464_v50  ;;  %v489_v5 = vmax.f32 %v440_v31, %v814_v39  ;;  %v490_v6 = vmax.f32 %v441_v18, %v819_v40  ;;  %v479_v10 = vld [vmem:[#allocation8 + $0x160] sm:$0x1]  ;;  %v482_v11 = vld [vmem:[#allocation8 + $0x190] sm:$0x1]  ;;  %508 = vst.msk [vmem:[#allocation2] sm:$0xff] %vm507_vm1, %v483_v63 }
  0x18   :  { %v491_v12 = vmax.f32 %v442_v21, %v467_v56  ;;  %v492_v13 = vmax.f32 %v443_v27, %v843_v46  ;;  %v493_v25 = vmax.f32 %v444_v28, %v848_v47  ;;  %v494_v14 = vmax.f32 %v445_v37, %v470_v57  ;;  %509 = vst.msk [vmem:[#allocation2 + $0x8] sm:$0xff] %vm507_vm1, %v484_v61 }
  0x19   :  { %511 = vst.msk [vmem:[#allocation2 + $0x10] sm:$0x1] %vm510_vm2, %v485_v1  ;;  %v495_v26 = vmax.f32 %v446_v38, %v872_v53  ;;  %v496_v32 = vmax.f32 %v447_v34, %v877_v54  ;;  %v497_v33 = vmax.f32 %v448_v43, %v473_v58  ;;  %v498_v39 = vmax.f32 %v449_v35, %v898_v59 }
  0x1a   :  { %512 = vst.msk [vmem:[#allocation2 + $0x18] sm:$0xff] %vm507_vm1, %v486_v62  ;;  %513 = vst.msk [vmem:[#allocation2 + $0x20] sm:$0xff] %vm507_vm1, %v487_v7  ;;  %v499_v40 = vmax.f32 %v450_v45, %v903_v60  ;;  %v500_v46 = vmax.f32 %v451_v41, %v476_v2  ;;  %v501_v47 = vmax.f32 %v452_v42, %v918_v3 }
  0x1b   :  { %514 = vst.msk [vmem:[#allocation2 + $0x28] sm:$0x1] %vm510_vm2, %v488_v9  ;;  %v502_v53 = vmax.f32 %v453_v48, %v923_v4  ;;  %517 = vst.msk [vmem:[#allocation2 + $0x40] sm:$0x1] %vm510_vm2, %v491_v12  ;;  %v503_v54 = vmax.f32 %v454_v49, %v479_v10  ;;  %v504_v59 = vmax.f32 %v455_v51, %v657_v0 }
  0x1c   :  { %515 = vst.msk [vmem:[#allocation2 + $0x30] sm:$0xff] %vm507_vm1, %v489_v5  ;;  %516 = vst.msk [vmem:[#allocation2 + $0x38] sm:$0xff] %vm507_vm1, %v490_v6  ;;  %v505_v15 = vmax.f32 %v456_v52, %v657_v0  ;;  %v506_v16 = vmax.f32 %v457_v55, %v482_v11 }
  0x1d   :  { %518 = vst.msk [vmem:[#allocation2 + $0x48] sm:$0xff] %vm507_vm1, %v492_v13  ;;  %519 = vst.msk [vmem:[#allocation2 + $0x50] sm:$0xff] %vm507_vm1, %v493_v25 }
  0x1e   :  { %520 = vst.msk [vmem:[#allocation2 + $0x58] sm:$0x1] %vm510_vm2, %v494_v14  ;;  %523 = vst.msk [vmem:[#allocation2 + $0x70] sm:$0x1] %vm510_vm2, %v497_v33 }
  0x1f   :  { %521 = vst.msk [vmem:[#allocation2 + $0x60] sm:$0xff] %vm507_vm1, %v495_v26  ;;  %522 = vst.msk [vmem:[#allocation2 + $0x68] sm:$0xff] %vm507_vm1, %v496_v32  ;;  %v533_v0 = vld [vmem:[#allocation2] ss:$2 sm:$0xff]  ;;  %v549_v60 = vld [vmem:[#allocation2 + $0x1] ss:$2 sm:$0xff] }
  0x20   :  { %524 = vst.msk [vmem:[#allocation2 + $0x78] sm:$0xff] %vm507_vm1, %v498_v39  ;;  %525 = vst.msk [vmem:[#allocation2 + $0x80] sm:$0xff] %vm507_vm1, %v499_v40  ;;  %v573_v3 = vld [vmem:[#allocation2 + $0x2] ss:$2 sm:$0xff]  ;;  %v564_v22 = vmax.f32 %v533_v0, %v549_v60 }
  0x21   :  { %526 = vst.msk [vmem:[#allocation2 + $0x88] sm:$0x1] %vm510_vm2, %v500_v46  ;;  %529 = vst.msk [vmem:[#allocation2 + $0xa0] sm:$0x1] %vm510_vm2, %v503_v54  ;;  %v535_v4 = vld [vmem:[#allocation2 + $0x18] ss:$2 sm:$0xff] }
  0x22   :  { %527 = vst.msk [vmem:[#allocation2 + $0x90] sm:$0xff] %vm507_vm1, %v501_v47  ;;  %528 = vst.msk [vmem:[#allocation2 + $0x98] sm:$0xff] %vm507_vm1, %v502_v53  ;;  %v551_v17 = vld [vmem:[#allocation2 + $0x19] ss:$2 sm:$0xff]  ;;  %v575_v19 = vld [vmem:[#allocation2 + $0x1a] ss:$2 sm:$0xff]  ;;  %v588_v21 = vmax.f32 %v564_v22, %v573_v3 }
  0x23   :  { %530 = vst.msk [vmem:[#allocation2 + $0xa8] sm:$0xff] %vm507_vm1, %v504_v59  ;;  %531 = vst.msk [vmem:[#allocation2 + $0xb0] sm:$0xff] %vm507_vm1, %v505_v15  ;;  %v537_v8 = vld [vmem:[#allocation2 + $0x30] ss:$2 sm:$0xff]  ;;  %v553_v24 = vld [vmem:[#allocation2 + $0x31] ss:$2 sm:$0xff]  ;;  %v565_v30 = vmax.f32 %v535_v4, %v551_v17 }
  0x24   :  { %532 = vst.msk [vmem:[#allocation2 + $0xb8] sm:$0x1] %vm510_vm2, %v506_v16  ;;  %v539_v23 = vld [vmem:[#allocation2 + $0x48] ss:$2 sm:$0xff]  ;;  %v555_v29 = vld [vmem:[#allocation2 + $0x49] ss:$2 sm:$0xff]  ;;  %v566_v20 = vmax.f32 %v537_v8, %v553_v24 }
  0x25   :  { %v567_v36 = vmax.f32 %v539_v23, %v555_v29  ;;  %v589_v34 = vmax.f32 %v565_v30, %v575_v19  ;;  %596 = vst.msk [vmem:[%s1053_s2] sm:$0xff] %vm507_vm1, %v588_v21  ;;  %v577_v48 = vld [vmem:[#allocation2 + $0x32] ss:$2 sm:$0xff] }
  0x26   :  { %v541_v31 = vld [vmem:[#allocation2 + $0x60] ss:$2 sm:$0xff]  ;;  %v557_v18 = vld [vmem:[#allocation2 + $0x61] ss:$2 sm:$0xff]  ;;  %v590_v56 = vmax.f32 %v566_v20, %v577_v48 }
  0x27   :  { %v543_v27 = vld [vmem:[#allocation2 + $0x78] ss:$2 sm:$0xff]  ;;  %v559_v37 = vld [vmem:[#allocation2 + $0x79] ss:$2 sm:$0xff]  ;;  %v568_v38 = vmax.f32 %v541_v31, %v557_v18  ;;  %597 = vst.msk [vmem:[%s1053_s2 + $0x8] sm:$0xff] %vm507_vm1, %v589_v34 }
  0x28   :  { %v569_v45 = vmax.f32 %v543_v27, %v559_v37  ;;  %v579_v50 = vld [vmem:[#allocation2 + $0x4a] ss:$2 sm:$0xff]  ;;  %v583_v51 = vld [vmem:[#allocation2 + $0x7a] ss:$2 sm:$0xff]  ;;  %598 = vst.msk [vmem:[%s1053_s2 + $0x10] sm:$0xff] %vm507_vm1, %v590_v56 }
  0x29   :  { %v545_v28 = vld [vmem:[#allocation2 + $0x90] ss:$2 sm:$0xff]  ;;  %v561_v35 = vld [vmem:[#allocation2 + $0x91] ss:$2 sm:$0xff]  ;;  %v591_v57 = vmax.f32 %v567_v36, %v579_v50 }
  0x2a   :  { %v547_v43 = vld [vmem:[#allocation2 + $0xa8] ss:$2 sm:$0xff]  ;;  %v563_v44 = vld [vmem:[#allocation2 + $0xa9] ss:$2 sm:$0xff]  ;;  %v570_v41 = vmax.f32 %v545_v28, %v561_v35  ;;  %v593_v63 = vmax.f32 %v569_v45, %v583_v51 }
  0x2b   :  { %v571_v42 = vmax.f32 %v547_v43, %v563_v44  ;;  %v581_v49 = vld [vmem:[#allocation2 + $0x62] ss:$2 sm:$0xff]  ;;  %v585_v52 = vld [vmem:[#allocation2 + $0x92] ss:$2 sm:$0xff]  ;;  %599 = vst.msk [vmem:[%s1053_s2 + $0x18] sm:$0xff] %vm507_vm1, %v591_v57 }
  0x2c   :  { %v587_v55 = vld [vmem:[#allocation2 + $0xaa] ss:$2 sm:$0xff]  ;;  %v592_v58 = vmax.f32 %v568_v38, %v581_v49  ;;  %v594_v61 = vmax.f32 %v570_v41, %v585_v52  ;;  %601 = vst.msk [vmem:[%s1053_s2 + $0x28] sm:$0xff] %vm507_vm1, %v593_v63 }
  0x2d   :  { %v595_v1 = vmax.f32 %v571_v42, %v587_v55 }
  0x2e   :  { %600 = vst.msk [vmem:[%s1053_s2 + $0x20] sm:$0xff] %vm507_vm1, %v592_v58  ;;  %602 = vst.msk [vmem:[%s1053_s2 + $0x30] sm:$0xff] %vm507_vm1, %v594_v61 }
  0x2f   :  { %603 = vst.msk [vmem:[%s1053_s2 + $0x38] sm:$0xff] %vm507_vm1, %v595_v1 }

</bundles_post_ra>
